<compile_context>
chip_gen: v7x
topology: tpu7x:2x2x1
jax: 0.10.0
libtpu: 0.0.40
codegen_flags: <defaults>
</compile_context>

<pallas_src>
import jax
import jax.numpy as jnp
from jax import lax
from jax.experimental import pallas as pl
from jax.experimental.pallas import tpu as pltpu


def _vmem_spec():
    # whole-array block resident in VMEM (all per-graph shapes here are small)
    return pl.BlockSpec(memory_space=pltpu.MemorySpace.VMEM)


def _apply_act(h, name):
    if name == "relu":
        return jnp.maximum(h, 0.0)
    if name == "identity":
        return h
    raise ValueError(f"unsupported activation: {name}")


# ---------------------------------------------------------------------------
# Fused kernel:
#   edge list -> dense a_msg / adj -> GraphConv stack -> Linear -> softmax
#   -> dense_mincut_pool losses
# ---------------------------------------------------------------------------
def _make_scn_kernel(num_layers: int, mp_act: str):
    def kernel(*refs):
        # inputs : src (1,E) i32, dst (1,E) i32, w (1,E) f32, x (N,F0) f32,
        #          (w_rel bf16, b_rel f32, w_root bf16) * L, w_mlp bf16, b_mlp f32
        # outputs: s_soft (N,C) f32, adj (N,N) f32, losses (1,2) f32 = [mc, orth]
        src_ref, dst_ref, w_ref, x_ref = refs[:4]
        layer_refs = refs[4:4 + 3 * num_layers]
        w_mlp_ref = refs[4 + 3 * num_layers]
        b_mlp_ref = refs[5 + 3 * num_layers]
        s_ref, adj_ref, loss_ref = refs[6 + 3 * num_layers:]

        e = src_ref.shape[1]
        n = x_ref.shape[0]

        # ---- build dense matrices in VMEM from the edge list (no XLA scatter,
        #      no [N,N] HBM round-trip).  One-hots: node id on sublanes, edge on lanes.
        node_iota = lax.broadcasted_iota(jnp.int32, (n, e), 0)           # [N, E]
        src_hit = src_ref[...] == node_iota                              # [N, E] bool
        dst_hit = dst_ref[...] == node_iota                              # [N, E] bool
        oh_src = src_hit.astype(jnp.bfloat16)
        oh_dst = dst_hit.astype(jnp.bfloat16)
        # weighted dst one-hot: select in f32, single cast -> bf16 MXU operand
        w_dst = jnp.where(dst_hit, w_ref[...], 0.0).astype(jnp.bfloat16)  # [N, E]

        dims = (((1,), (1,)), ((), ()))   # contract over the edge axis (A @ B^T form)
        # a_msg[i, j] = sum_e w_e * [dst_e == i] * [src_e == j]   (message matrix dst x src)
        a_msg = lax.dot_general(w_dst, oh_src, dims,
                                preferred_element_type=jnp.float32)       # [N, N] f32
        a_msg_b = a_msg.astype(jnp.bfloat16)
        # adj[i, j] = sum_e [src_e == i] * [dst_e == j]   (to_dense_adj, exact counts)
        adj = lax.dot_general(oh_src, oh_dst, dims,
                              preferred_element_type=jnp.float32)         # [N, N] f32
        adj_ref[...] = adj
        adj_b = adj.astype(jnp.bfloat16)

        # ---- message-passing stack: h = act( (A_msg @ h) @ W_rel + h @ W_root + b_rel )
        h = x_ref[...]                             # f32
        h_b = h.astype(jnp.bfloat16)               # hoisted bf16 copy, reused per layer
        for layer in range(num_layers):
            w_rel = layer_refs[3 * layer][...]     # bf16 [F_in, F_out]
            b_rel = layer_refs[3 * layer + 1][...] # f32  [1, F_out]
            w_root = layer_refs[3 * layer + 2][...]  # bf16 [F_in, F_out]
            f_in, f_out = w_rel.shape
            if f_out < f_in:
                # reassociate (A@h)@W_rel == A@(h@W_rel): narrows the N^2 matmul
                hw = jnp.dot(h_b, w_rel, preferred_element_type=jnp.float32)
                rel = jnp.dot(a_msg_b, hw.astype(jnp.bfloat16),
                              preferred_element_type=jnp.float32)
            else:
                agg = jnp.dot(a_msg_b, h_b, preferred_element_type=jnp.float32)
                rel = jnp.dot(agg.astype(jnp.bfloat16), w_rel,
                              preferred_element_type=jnp.float32)
            out = rel + jnp.dot(h_b, w_root, preferred_element_type=jnp.float32) + b_rel
            h = _apply_act(out, mp_act)
            h_b = h.astype(jnp.bfloat16)

        # ---- cluster-assignment MLP (mlp_units == [] -> single Linear)
        logits = (jnp.dot(h_b, w_mlp_ref[...], preferred_element_type=jnp.float32)
                  + b_mlp_ref[...])                                       # [N, C]

        # ---- softmax (f32 VPU math; EUP approx reciprocal for the denominator)
        m = jnp.max(logits, axis=-1, keepdims=True)
        ex = jnp.exp(logits - m)
        s = ex * pl.reciprocal(jnp.sum(ex, axis=-1, keepdims=True), approx=True)
        s_ref[...] = s

        # ---- dense_mincut_pool losses
        s_b = s.astype(jnp.bfloat16)
        a_s = jnp.dot(adj_b, s_b, preferred_element_type=jnp.float32)     # [N, C]
        mincut_num = jnp.sum(s * a_s)                                     # tr(S^T A S)
        deg = jnp.sum(adj, axis=-1, keepdims=True)                        # f32 adj already resident
        mincut_den = jnp.sum(deg * s * s)                                 # tr(S^T D S)
        mc = -(mincut_num / mincut_den)

        # ss = S^T S (contract over node axis, no explicit transpose), f32 for loss precision
        ss = lax.dot_general(s, s, (((0,), (0,)), ((), ())),
                             preferred_element_type=jnp.float32)          # [C, C]
        ss_fro = jnp.sqrt(jnp.sum(ss * ss))
        c = s.shape[1]
        row = lax.broadcasted_iota(jnp.int32, (c, c), 0)
        col = lax.broadcasted_iota(jnp.int32, (c, c), 1)
        eye = (row == col).astype(jnp.float32)
        diff = ss / ss_fro - eye / jnp.sqrt(jnp.float32(c))
        orth = jnp.sqrt(jnp.sum(diff * diff))

        # pack both scalar losses into one tiny output (single epilogue DMA)
        sel = lax.broadcasted_iota(jnp.int32, (1, 2), 1)
        loss_ref[...] = jnp.where(sel == 0, mc, orth)

    return kernel


def scn_forward(src, dst, w, x, layer_params, mlp_w, mlp_b, mp_act):
    n = x.shape[0]
    e = src.shape[1]
    c = mlp_w.shape[1]
    num_layers = len(layer_params)

    inputs = [src, dst, w, x]
    for (w_rel, b_rel, w_root) in layer_params:
        inputs += [w_rel, b_rel, w_root]
    inputs += [mlp_w, mlp_b]

    # Advisory cost estimate for XLA's scheduler.
    feat = [x.shape[1]] + [p[0].shape[1] for p in layer_params]
    flops = 4 * e * n * n                                      # one-hot contractions
    for f_in, f_out in zip(feat[:-1], feat[1:]):
        flops += 2 * n * n * min(f_in, f_out) + 4 * n * f_in * f_out
    flops += 2 * n * feat[-1] * c                              # mlp
    flops += 2 * n * n * c + 2 * n * n + 2 * n * c * c         # adj@s, deg, S^T S
    bytes_accessed = (sum(int(a.size) * a.dtype.itemsize for a in inputs)
                      + n * c * 4 + n * n * 4 + 8)
    cost = pl.CostEstimate(flops=int(flops), transcendentals=int(n * c + n + 4),
                           bytes_accessed=int(bytes_accessed))

    return pl.pallas_call(
        _make_scn_kernel(num_layers, mp_act),
        out_shape=(
            jax.ShapeDtypeStruct((n, c), jnp.float32),   # softmax(s)
            jax.ShapeDtypeStruct((n, n), jnp.float32),   # dense adjacency (to_dense_adj)
            jax.ShapeDtypeStruct((1, 2), jnp.float32),   # [mc_loss, o_loss]
        ),
        in_specs=[_vmem_spec()] * len(inputs),
        out_specs=(_vmem_spec(), _vmem_spec(), _vmem_spec()),
        compiler_params=pltpu.CompilerParams(vmem_limit_bytes=4 * 1024 * 1024),
        cost_estimate=cost,
    )(*inputs)


# ---------------------------------------------------------------------------
# SCN module (parameters + forward glue in plain JAX, hot path in one fused kernel)
# ---------------------------------------------------------------------------
class SCN:
    def __init__(self, mp_units, mp_act, num_features, num_clusters,
                 mlp_units=(), mlp_act="identity", key=None):
        assert mlp_act == "identity"  # matches the default in the reference
        if len(tuple(mlp_units)) != 0:
            # TODO(synk): non-empty mlp_units mirrors the reference's (buggy) loop; only mlp_units=[] supported.
            raise NotImplementedError("only mlp_units=[] is supported")
        key = jax.random.PRNGKey(42) if key is None else key
        self.mp_act = mp_act
        self.mp_params = []
        dims = [num_features] + list(mp_units)
        for f_in, f_out in zip(dims[:-1], dims[1:]):
            key, k1, k2, k3 = jax.random.split(key, 4)
            # weights kept in bf16 host-side (MXU operands); biases stay f32 (VPU adds)
            w_rel = (jax.random.normal(k1, (f_in, f_out), jnp.float32) * 0.1).astype(jnp.bfloat16)
            b_rel = jax.random.normal(k2, (1, f_out), jnp.float32) * 0.1
            w_root = (jax.random.normal(k3, (f_in, f_out), jnp.float32) * 0.1).astype(jnp.bfloat16)
            self.mp_params.append((w_rel, b_rel, w_root))
        out_channels = mp_units[-1]
        key, k1, k2 = jax.random.split(key, 3)
        self.mlp_w = (jax.random.normal(k1, (out_channels, num_clusters), jnp.float32)
                      * 0.1).astype(jnp.bfloat16)
        self.mlp_b = jax.random.normal(k2, (1, num_clusters), jnp.float32) * 0.1

    def __call__(self, x, edge_index, edge_weight):
        # Raw edge list goes straight into the kernel (nodes on sublanes, edges on lanes);
        # the dense a_msg / adj matrices are built in VMEM inside the kernel.
        src = edge_index[0].astype(jnp.int32).reshape(1, -1)     # [1, E]
        dst = edge_index[1].astype(jnp.int32).reshape(1, -1)     # [1, E]
        w = edge_weight.astype(jnp.float32).reshape(1, -1)       # [1, E]

        s_soft, adj, losses = scn_forward(
            src, dst, w, x.astype(jnp.float32),
            self.mp_params, self.mlp_w, self.mlp_b, self.mp_act)
        return s_soft, losses[0, 0], losses[0, 1], adj[None]     # adj -> [1, N, N]


if __name__ == "__main__":
    N_NODES = 16
    NUM_FEATURES = 8
    MP_UNITS = [32, 16]
    NUM_CLUSTERS = 4

    key = jax.random.PRNGKey(0)
    kx, kw = jax.random.split(key)
    x = jax.random.normal(kx, (N_NODES, NUM_FEATURES), jnp.float32)

    # deterministic bidirectional ring graph
    src = jnp.concatenate([jnp.arange(N_NODES), (jnp.arange(N_NODES) + 1) % N_NODES])
    dst = jnp.concatenate([(jnp.arange(N_NODES) + 1) % N_NODES, jnp.arange(N_NODES)])
    edge_index = jnp.stack([src, dst]).astype(jnp.int32)          # [2, E], E = 32
    edge_weight = jax.random.uniform(kw, (edge_index.shape[1],), jnp.float32) + 0.5

    model = SCN(MP_UNITS, "relu", NUM_FEATURES, NUM_CLUSTERS, mlp_units=[],
                mlp_act="identity")

    s_soft, mc_loss, o_loss, adj = model(x, edge_index, edge_weight)
    jax.block_until_ready((s_soft, mc_loss, o_loss, adj))

    assert s_soft.shape == (N_NODES, NUM_CLUSTERS)
    assert adj.shape == (1, N_NODES, N_NODES)
    assert bool(jnp.all(jnp.isfinite(s_soft)))
    assert bool(jnp.isfinite(mc_loss)) and bool(jnp.isfinite(o_loss))
    # in-kernel adjacency build must match to_dense_adj (ring graph: out-degree 2 per node)
    assert bool(jnp.allclose(jnp.sum(adj[0], axis=-1), 2.0))
    print("KERNEL_OK")
</pallas_src>

<mosaic_0001>
module attributes {stable_mosaic.version = 11 : i64} {
  func.func @kernel(%arg0: memref<1x32xi32, #tpu.memory_space<vmem>>, %arg1: memref<1x32xi32, #tpu.memory_space<vmem>>, %arg2: memref<1x32xf32, #tpu.memory_space<vmem>>, %arg3: memref<16x8xf32, #tpu.memory_space<vmem>>, %arg4: memref<8x32xbf16, #tpu.memory_space<vmem>>, %arg5: memref<1x32xf32, #tpu.memory_space<vmem>>, %arg6: memref<8x32xbf16, #tpu.memory_space<vmem>>, %arg7: memref<32x16xbf16, #tpu.memory_space<vmem>>, %arg8: memref<1x16xf32, #tpu.memory_space<vmem>>, %arg9: memref<32x16xbf16, #tpu.memory_space<vmem>>, %arg10: memref<16x4xbf16, #tpu.memory_space<vmem>>, %arg11: memref<1x4xf32, #tpu.memory_space<vmem>>, %arg12: memref<16x4xf32, #tpu.memory_space<vmem>>, %arg13: memref<16x16xf32, #tpu.memory_space<vmem>>, %arg14: memref<1x2xf32, #tpu.memory_space<vmem>>) attributes {dimension_semantics = [], scalar_prefetch = 0 : i64, scratch_operands = 0 : i64, tpu.core_type = #tpu.core_type<tc>} {
    %0 = tpu.iota {dimensions = array<i32: 0>} : vector<16x32xi32>
    %c0 = arith.constant 0 : index
    %c0_0 = arith.constant 0 : index
    %1 = vector.load %arg0[%c0, %c0_0] : memref<1x32xi32, #tpu.memory_space<vmem>>, vector<1x32xi32>
    %2 = vector.broadcast %1 : vector<1x32xi32> to vector<16x32xi32>
    %3 = arith.cmpi eq, %2, %0 : vector<16x32xi32>
    %c0_1 = arith.constant 0 : index
    %c0_2 = arith.constant 0 : index
    %4 = vector.load %arg1[%c0_1, %c0_2] : memref<1x32xi32, #tpu.memory_space<vmem>>, vector<1x32xi32>
    %5 = vector.broadcast %4 : vector<1x32xi32> to vector<16x32xi32>
    %6 = arith.cmpi eq, %5, %0 : vector<16x32xi32>
    %7 = arith.extui %3 : vector<16x32xi1> to vector<16x32xi32>
    %8 = arith.sitofp %7 : vector<16x32xi32> to vector<16x32xf32>
    %9 = arith.truncf %8 : vector<16x32xf32> to vector<16x32xbf16>
    %10 = arith.extui %6 : vector<16x32xi1> to vector<16x32xi32>
    %11 = arith.sitofp %10 : vector<16x32xi32> to vector<16x32xf32>
    %12 = arith.truncf %11 : vector<16x32xf32> to vector<16x32xbf16>
    %c0_3 = arith.constant 0 : index
    %c0_4 = arith.constant 0 : index
    %13 = vector.load %arg2[%c0_3, %c0_4] : memref<1x32xf32, #tpu.memory_space<vmem>>, vector<1x32xf32>
    %cst = arith.constant 0.000000e+00 : f32
    %14 = vector.shape_cast %13 : vector<1x32xf32> to vector<1x32xf32>
    %15 = vector.broadcast %14 : vector<1x32xf32> to vector<16x32xf32>
    %16 = vector.broadcast %cst : f32 to vector<16x32xf32>
    %17 = arith.select %6, %15, %16 : vector<16x32xi1>, vector<16x32xf32>
    %18 = arith.truncf %17 : vector<16x32xf32> to vector<16x32xbf16>
    %cst_5 = arith.constant dense<0.000000e+00> : vector<16x16xf32>
    %19 = tpu.matmul %18, %9, %cst_5 {dimension_numbers = #tpu.dot_dimension_numbers<[1], [1], [0], [0], [0, 0, 1, 0], [], []>} : vector<16x32xbf16>, vector<16x32xbf16>, vector<16x16xf32> -> vector<16x16xf32>
    %20 = arith.truncf %19 : vector<16x16xf32> to vector<16x16xbf16>
    %cst_6 = arith.constant dense<0.000000e+00> : vector<16x16xf32>
    %21 = tpu.matmul %9, %12, %cst_6 {dimension_numbers = #tpu.dot_dimension_numbers<[1], [1], [0], [0], [0, 0, 1, 0], [], []>} : vector<16x32xbf16>, vector<16x32xbf16>, vector<16x16xf32> -> vector<16x16xf32>
    %c0_7 = arith.constant 0 : index
    %c0_8 = arith.constant 0 : index
    %22 = vector.load %arg13[%c0_7, %c0_8] : memref<16x16xf32, #tpu.memory_space<vmem>>, vector<16x16xf32>
    tpu.vector_store %arg13[%c0_7, %c0_8], %21 {strides = array<i32>} : memref<16x16xf32, #tpu.memory_space<vmem>>, vector<16x16xf32>,
    %23 = arith.truncf %21 : vector<16x16xf32> to vector<16x16xbf16>
    %c0_9 = arith.constant 0 : index
    %c0_10 = arith.constant 0 : index
    %24 = vector.load %arg3[%c0_9, %c0_10] : memref<16x8xf32, #tpu.memory_space<vmem>>, vector<16x8xf32>
    %25 = arith.truncf %24 : vector<16x8xf32> to vector<16x8xbf16>
    %c0_11 = arith.constant 0 : index
    %c0_12 = arith.constant 0 : index
    %26 = vector.load %arg4[%c0_11, %c0_12] : memref<8x32xbf16, #tpu.memory_space<vmem>>, vector<8x32xbf16>
    %c0_13 = arith.constant 0 : index
    %c0_14 = arith.constant 0 : index
    %27 = vector.load %arg5[%c0_13, %c0_14] : memref<1x32xf32, #tpu.memory_space<vmem>>, vector<1x32xf32>
    %c0_15 = arith.constant 0 : index
    %c0_16 = arith.constant 0 : index
    %28 = vector.load %arg6[%c0_15, %c0_16] : memref<8x32xbf16, #tpu.memory_space<vmem>>, vector<8x32xbf16>
    %cst_17 = arith.constant dense<0.000000e+00> : vector<16x8xf32>
    %29 = tpu.matmul %20, %25, %cst_17 {dimension_numbers = #tpu.dot_dimension_numbers<[1], [0], [0], [1], [0, 0, 1, 1], [], []>} : vector<16x16xbf16>, vector<16x8xbf16>, vector<16x8xf32> -> vector<16x8xf32>
    %30 = arith.truncf %29 : vector<16x8xf32> to vector<16x8xbf16>
    %cst_18 = arith.constant dense<0.000000e+00> : vector<16x32xf32>
    %31 = tpu.matmul %30, %26, %cst_18 {dimension_numbers = #tpu.dot_dimension_numbers<[1], [0], [0], [1], [0, 0, 1, 1], [], []>} : vector<16x8xbf16>, vector<8x32xbf16>, vector<16x32xf32> -> vector<16x32xf32>
    %cst_19 = arith.constant dense<0.000000e+00> : vector<16x32xf32>
    %32 = tpu.matmul %25, %28, %cst_19 {dimension_numbers = #tpu.dot_dimension_numbers<[1], [0], [0], [1], [0, 0, 1, 1], [], []>} : vector<16x8xbf16>, vector<8x32xbf16>, vector<16x32xf32> -> vector<16x32xf32>
    %33 = arith.addf %31, %32 : vector<16x32xf32>
    %34 = vector.broadcast %27 : vector<1x32xf32> to vector<16x32xf32>
    %35 = arith.addf %33, %34 : vector<16x32xf32>
    %cst_20 = arith.constant 0.000000e+00 : f32
    %36 = vector.broadcast %cst_20 : f32 to vector<16x32xf32>
    %37 = arith.maximumf %35, %36 : vector<16x32xf32>
    %38 = arith.truncf %37 : vector<16x32xf32> to vector<16x32xbf16>
    %c0_21 = arith.constant 0 : index
    %c0_22 = arith.constant 0 : index
    %39 = vector.load %arg7[%c0_21, %c0_22] : memref<32x16xbf16, #tpu.memory_space<vmem>>, vector<32x16xbf16>
    %c0_23 = arith.constant 0 : index
    %c0_24 = arith.constant 0 : index
    %40 = vector.load %arg8[%c0_23, %c0_24] : memref<1x16xf32, #tpu.memory_space<vmem>>, vector<1x16xf32>
    %c0_25 = arith.constant 0 : index
    %c0_26 = arith.constant 0 : index
    %41 = vector.load %arg9[%c0_25, %c0_26] : memref<32x16xbf16, #tpu.memory_space<vmem>>, vector<32x16xbf16>
    %cst_27 = arith.constant dense<0.000000e+00> : vector<16x16xf32>
    %42 = tpu.matmul %38, %39, %cst_27 {dimension_numbers = #tpu.dot_dimension_numbers<[1], [0], [0], [1], [0, 0, 1, 1], [], []>} : vector<16x32xbf16>, vector<32x16xbf16>, vector<16x16xf32> -> vector<16x16xf32>
    %43 = arith.truncf %42 : vector<16x16xf32> to vector<16x16xbf16>
    %cst_28 = arith.constant dense<0.000000e+00> : vector<16x16xf32>
    %44 = tpu.matmul %20, %43, %cst_28 {dimension_numbers = #tpu.dot_dimension_numbers<[1], [0], [0], [1], [0, 0, 1, 1], [], []>} : vector<16x16xbf16>, vector<16x16xbf16>, vector<16x16xf32> -> vector<16x16xf32>
    %cst_29 = arith.constant dense<0.000000e+00> : vector<16x16xf32>
    %45 = tpu.matmul %38, %41, %cst_29 {dimension_numbers = #tpu.dot_dimension_numbers<[1], [0], [0], [1], [0, 0, 1, 1], [], []>} : vector<16x32xbf16>, vector<32x16xbf16>, vector<16x16xf32> -> vector<16x16xf32>
    %46 = arith.addf %44, %45 : vector<16x16xf32>
    %47 = vector.broadcast %40 : vector<1x16xf32> to vector<16x16xf32>
    %48 = arith.addf %46, %47 : vector<16x16xf32>
    %cst_30 = arith.constant 0.000000e+00 : f32
    %49 = vector.broadcast %cst_30 : f32 to vector<16x16xf32>
    %50 = arith.maximumf %48, %49 : vector<16x16xf32>
    %51 = arith.truncf %50 : vector<16x16xf32> to vector<16x16xbf16>
    %c0_31 = arith.constant 0 : index
    %c0_32 = arith.constant 0 : index
    %52 = vector.load %arg10[%c0_31, %c0_32] : memref<16x4xbf16, #tpu.memory_space<vmem>>, vector<16x4xbf16>
    %cst_33 = arith.constant dense<0.000000e+00> : vector<16x4xf32>
    %53 = tpu.matmul %51, %52, %cst_33 {dimension_numbers = #tpu.dot_dimension_numbers<[1], [0], [0], [1], [0, 0, 1, 1], [], []>} : vector<16x16xbf16>, vector<16x4xbf16>, vector<16x4xf32> -> vector<16x4xf32>
    %c0_34 = arith.constant 0 : index
    %c0_35 = arith.constant 0 : index
    %54 = vector.load %arg11[%c0_34, %c0_35] : memref<1x4xf32, #tpu.memory_space<vmem>>, vector<1x4xf32>
    %55 = vector.broadcast %54 : vector<1x4xf32> to vector<16x4xf32>
    %56 = arith.addf %53, %55 : vector<16x4xf32>
    %cst_36 = arith.constant dense<0xFF800000> : vector<16xf32>
    %57 = vector.multi_reduction <maximumf>, %56, %cst_36 [1] : vector<16x4xf32> to vector<16xf32>
    %58 = vector.shape_cast %57 : vector<16xf32> to vector<16x1xf32>
    %59 = vector.broadcast %58 : vector<16x1xf32> to vector<16x4xf32>
    %60 = arith.subf %56, %59 : vector<16x4xf32>
    %61 = math.exp %60 : vector<16x4xf32>
    %cst_37 = arith.constant dense<0.000000e+00> : vector<16xf32>
    %62 = vector.multi_reduction <add>, %61, %cst_37 [1] : vector<16x4xf32> to vector<16xf32>
    %63 = vector.shape_cast %62 : vector<16xf32> to vector<16x1xf32>
    %64 = tpu.reciprocal %63 {approx = true} : vector<16x1xf32> -> vector<16x1xf32>
    %65 = vector.broadcast %64 : vector<16x1xf32> to vector<16x4xf32>
    %66 = arith.mulf %61, %65 : vector<16x4xf32>
    %c0_38 = arith.constant 0 : index
    %c0_39 = arith.constant 0 : index
    %67 = vector.load %arg12[%c0_38, %c0_39] : memref<16x4xf32, #tpu.memory_space<vmem>>, vector<16x4xf32>
    tpu.vector_store %arg12[%c0_38, %c0_39], %66 {strides = array<i32>} : memref<16x4xf32, #tpu.memory_space<vmem>>, vector<16x4xf32>,
    %68 = arith.truncf %66 : vector<16x4xf32> to vector<16x4xbf16>
    %cst_40 = arith.constant dense<0.000000e+00> : vector<16x4xf32>
    %69 = tpu.matmul %23, %68, %cst_40 {dimension_numbers = #tpu.dot_dimension_numbers<[1], [0], [0], [1], [0, 0, 1, 1], [], []>} : vector<16x16xbf16>, vector<16x4xbf16>, vector<16x4xf32> -> vector<16x4xf32>
    %70 = arith.mulf %66, %69 : vector<16x4xf32>
    %71 = vector.shape_cast %70 : vector<16x4xf32> to vector<1x16x4xf32>
    %cst_41 = arith.constant dense<0.000000e+00> : vector<1xf32>
    %72 = vector.multi_reduction <add>, %71, %cst_41 [1, 2] : vector<1x16x4xf32> to vector<1xf32>
    %73 = vector.shape_cast %72 : vector<1xf32> to vector<1x1x1xf32>
    %74 = vector.extract %73[0, 0, 0] : f32 from vector<1x1x1xf32>
    %cst_42 = arith.constant dense<0.000000e+00> : vector<16xf32>
    %75 = vector.multi_reduction <add>, %21, %cst_42 [1] : vector<16x16xf32> to vector<16xf32>
    %76 = vector.shape_cast %75 : vector<16xf32> to vector<16x1xf32>
    %77 = vector.broadcast %76 : vector<16x1xf32> to vector<16x4xf32>
    %78 = arith.mulf %77, %66 : vector<16x4xf32>
    %79 = arith.mulf %78, %66 : vector<16x4xf32>
    %80 = vector.shape_cast %79 : vector<16x4xf32> to vector<1x16x4xf32>
    %cst_43 = arith.constant dense<0.000000e+00> : vector<1xf32>
    %81 = vector.multi_reduction <add>, %80, %cst_43 [1, 2] : vector<1x16x4xf32> to vector<1xf32>
    %82 = vector.shape_cast %81 : vector<1xf32> to vector<1x1x1xf32>
    %83 = vector.extract %82[0, 0, 0] : f32 from vector<1x1x1xf32>
    %84 = arith.divf %74, %83 : f32
    %cst_44 = arith.constant 0.000000e+00 : f32
    %85 = arith.subf %cst_44, %84 : f32
    %cst_45 = arith.constant dense<0.000000e+00> : vector<4x4xf32>
    %86 = tpu.matmul %66, %66, %cst_45 {dimension_numbers = #tpu.dot_dimension_numbers<[0], [0], [1], [1], [0, 1, 1, 1], [], []>} : vector<16x4xf32>, vector<16x4xf32>, vector<4x4xf32> -> vector<4x4xf32>
    %87 = arith.mulf %86, %86 : vector<4x4xf32>
    %88 = vector.shape_cast %87 : vector<4x4xf32> to vector<1x4x4xf32>
    %cst_46 = arith.constant dense<0.000000e+00> : vector<1xf32>
    %89 = vector.multi_reduction <add>, %88, %cst_46 [1, 2] : vector<1x4x4xf32> to vector<1xf32>
    %90 = vector.shape_cast %89 : vector<1xf32> to vector<1x1x1xf32>
    %91 = vector.extract %90[0, 0, 0] : f32 from vector<1x1x1xf32>
    %92 = math.sqrt %91 : f32
    %93 = tpu.iota {dimensions = array<i32: 0>} : vector<4x4xi32>
    %94 = tpu.iota {dimensions = array<i32: 1>} : vector<4x4xi32>
    %95 = arith.cmpi eq, %93, %94 : vector<4x4xi32>
    %96 = arith.extui %95 : vector<4x4xi1> to vector<4x4xi32>
    %97 = arith.sitofp %96 : vector<4x4xi32> to vector<4x4xf32>
    %98 = vector.broadcast %92 : f32 to vector<4x4xf32>
    %99 = arith.divf %86, %98 : vector<4x4xf32>
    %cst_47 = arith.constant 4.000000e+00 : f32
    %100 = math.sqrt %cst_47 : f32
    %101 = vector.broadcast %100 : f32 to vector<4x4xf32>
    %102 = arith.divf %97, %101 : vector<4x4xf32>
    %103 = arith.subf %99, %102 : vector<4x4xf32>
    %104 = arith.mulf %103, %103 : vector<4x4xf32>
    %105 = vector.shape_cast %104 : vector<4x4xf32> to vector<1x4x4xf32>
    %cst_48 = arith.constant dense<0.000000e+00> : vector<1xf32>
    %106 = vector.multi_reduction <add>, %105, %cst_48 [1, 2] : vector<1x4x4xf32> to vector<1xf32>
    %107 = vector.shape_cast %106 : vector<1xf32> to vector<1x1x1xf32>
    %108 = vector.extract %107[0, 0, 0] : f32 from vector<1x1x1xf32>
    %109 = math.sqrt %108 : f32
    %110 = tpu.iota {dimensions = array<i32: 1>} : vector<1x2xi32>
    %c0_i32 = arith.constant 0 : i32
    %111 = vector.broadcast %c0_i32 : i32 to vector<1x2xi32>
    %112 = arith.cmpi eq, %110, %111 : vector<1x2xi32>
    %113 = vector.broadcast %85 : f32 to vector<1x2xf32>
    %114 = vector.broadcast %109 : f32 to vector<1x2xf32>
    %115 = arith.select %112, %113, %114 : vector<1x2xi1>, vector<1x2xf32>
    %c0_49 = arith.constant 0 : index
    %c0_50 = arith.constant 0 : index
    %116 = vector.load %arg14[%c0_49, %c0_50] : memref<1x2xf32, #tpu.memory_space<vmem>>, vector<1x2xf32>
    tpu.vector_store %arg14[%c0_49, %c0_50], %115 {strides = array<i32>} : memref<1x2xf32, #tpu.memory_space<vmem>>, vector<1x2xf32>,
    return
  }
}

</mosaic_0001>

<bundles_post_ra>
// kernel: tpu_custom_call.1
= control target key start
LH: loop header
LB: loop body
LE: loop exit
PB: predicated region body
PF: predicated region fallthrough
CT: control target
= control target key end

     0   :  { %20 = vsyncpa [#allocation3], 0  ;;  %v47_v0 = vlaneseq  ;;  %v1093_v1 = vmov 0.0   ;;  %vm1094_vm0 = vmmov 0   ;;  %s1356_s0 = inlined_call_operand.vmem [shape: s32[1,32], index: 0, kind: input, shape index: {}]   ;;  %s1357_s1 = inlined_call_operand.vmem [shape: s32[1,32], index: 1, kind: input, shape index: {}]   ;;  %s1358_s2 = inlined_call_operand.vmem [shape: f32[1,32], index: 2, kind: input, shape index: {}]   ;;  %s1359_s3 = inlined_call_operand.vmem [shape: f32[16,8], index: 3, kind: input, shape index: {}]   ;;  %s1360_s4 = inlined_call_operand.vmem [shape: bf16[8,32], index: 4, kind: input, shape index: {}]   ;;  %s1361_s5 = inlined_call_operand.vmem [shape: f32[1,32], index: 5, kind: input, shape index: {}]   ;;  %s1362_s6 = inlined_call_operand.vmem [shape: bf16[8,32], index: 6, kind: input, shape index: {}]   ;;  %s1363_s7 = inlined_call_operand.vmem [shape: bf16[32,16], index: 7, kind: input, shape index: {}]   ;;  %s1364_s8 = inlined_call_operand.vmem [shape: f32[1,16], index: 8, kind: input, shape index: {}]   ;;  %s1365_s9 = inlined_call_operand.vmem [shape: bf16[32,16], index: 9, kind: input, shape index: {}]   ;;  %s1366_s10 = inlined_call_operand.vmem [shape: bf16[16,4], index: 10, kind: input, shape index: {}]   ;;  %s1367_s11 = inlined_call_operand.vmem [shape: f32[1,4], index: 11, kind: input, shape index: {}]   ;;  %s1368_s12 = inlined_call_operand.vmem [shape: f32[16,4], index: 12, kind: output, shape index: {0}]   ;;  %s1369_s13 = inlined_call_operand.hbm [shape: f32[16,16], index: 13, kind: output, shape index: {1}]   ;;  %s1370_s14 = inlined_call_operand.hbm [shape: f32[1,2], index: 14, kind: output, shape index: {2}]  }
   0x1   :  { %929 = vmatprep.subr.bf16.mxu0 %v1093_v1  ;;  %v877_v2 = vld [vmem:[%s1356_s0] ss:$0 sm:$0xff]  ;;  %935 = vmatprep.subr.bf16.mxu1 %v1093_v1 }
   0x2   :  { %v1181_v3 = vshrl.u32 %v47_v0, 7  ;;  %931 = vmatprep.mubr.msk.bf16.mxu0 %vm1094_vm0, %v1093_v1  ;;  %937 = vmatprep.mubr.msk.bf16.mxu1 %vm1094_vm0, %v1093_v1  ;;  %v878_v4 = vld [vmem:[%s1357_s1] ss:$0 sm:$0xff] }
   0x4   :  { %v49_v5 = vadd.s32 8, %v1181_v3  ;;  %vm55_vm1 = vcmp.eq.s32.totalorder %v877_v2, %v1181_v3 }
   0x5   :  { %v879_v6 = vsel %vm55_vm1, 1.0, %v1093_v1 }
   0x6   :  { %vm56_vm2 = vcmp.eq.s32.totalorder %v877_v2, %v49_v5 }
   0x7   :  { %21 = vsyncpa [#allocation5], 0  ;;  %v880_v7 = vsel %vm56_vm2, 1.0, %v1093_v1  ;;  %vm84_vm3 = vcmask 261120   ;;  %vm63_vm4 = vcmp.eq.s32.totalorder %v878_v4, %v49_v5  ;;  %vm62_vm5 = vcmp.eq.s32.totalorder %v878_v4, %v1181_v3  ;;  %v883_v9 = vld [vmem:[%s1358_s2] ss:$0 sm:$0xff] }
   0x8   :  { %v68_v8 = vpack.c.bf16 %v880_v7, %v879_v6  ;;  %v81_v11 = vsel %vm62_vm5, %v883_v9, 0.0  ;;  %v82_v12 = vsel %vm63_vm4, %v883_v9, 0.0  ;;  %v181_v14 = vld [vmem:[%s1359_s3] sm:$0xff]  ;;  %v182_v15 = vld [vmem:[%s1359_s3 + $0x8] sm:$0xff]  ;;  %v881_v17 = vsel %vm62_vm5, 1.0, %v1093_v1  ;;  %s1096_s21 = smov [#allocation2]  }
   0x9   :  { %v83_v13 = vpack.c.bf16 %v82_v12, %v81_v11  ;;  %v183_v16 = vpack.c.bf16 %v182_v15, %v181_v14  ;;  %v882_v18 = vsel %vm63_vm4, 1.0, %v1093_v1  ;;  %v186_v21 = vld [vmem:[%s1362_s6] sm:$0xf]  ;;  %vm236_vm6 = vcmask 1043456   ;;  %v1026_v46 = vld [vmem:[%s1363_s7 + $0x8] sm:$0xff]   ;;  %s850_s3 = sshll.u32 %s1096_s21, 4  ;;  %s851_s3 = int_to_ptr.vmem [resolvable:$true] %s850_s3 }
   0xa   :  { %v89_v10 = vsel %vm84_vm3, %v68_v8, 0  ;;  %v73_v19 = vpack.c.bf16 %v882_v18, %v881_v17  ;;  %v238_v22 = vsel %vm236_vm6, %v186_v21, 0  ;;  %vm177_vm7 = vcmask 130048   ;;  %v184_v28 = vld [vmem:[%s1360_s4] sm:$0xf]  ;;  %v1027_v47 = vld [vmem:[%s1365_s9 + $0x8] sm:$0xff]   ;;  %p1050_p1 = scmp.lt.s32.totalorder %s851_s3, %s851_s3 }
   0xb   :  { %930 = vmatpush3.bf16.xpose.msra.mxu0 %v89_v10  ;;  %vm232_vm8 = vcmask 64512   ;;  %v285_v29 = vsel %vm236_vm6, %v184_v28, 0  ;;  %v1024_v44 = vld [vmem:[%s1363_s7] sm:$0xff]   ;;  %vm569_vm9 = vcmask 31744   ;;  %vm786_vm10 = vcmask 27648   ;;  %s1045_s6 = scalar_lea.vmem %s851_s3, 256 }
   0xc   :  { %941 = vmatprep.subr.bf16.mxu0 %v1093_v1  ;;  %v134_v20 = vsel %vm84_vm3, %v73_v19, 0  ;;  %v1025_v45 = vld [vmem:[%s1365_s9] sm:$0xff]   ;;  %p1046_p0 = scmp.ne.s32.totalorder %s851_s3, %s1045_s6  ;;  %p1051_p2 = scmp.lt.s32.totalorder %s1045_s6, %s1045_s6 }
   0xd   :  { %936 = vmatpush3.bf16.xpose.msra.mxu1 %v134_v20  ;;  %v889_v48 = vld [vmem:[%s1361_s5] ss:$0 sm:$0xff] }
   0xe   :  { %947 = vmatprep.subr.bf16.mxu1 %v1093_v1  ;;  %v897_v9 = vld [vmem:[%s1364_s8] ss:$0 sm:$0xff]  ;;  %p1052_p3 = por %p1051_p2, %p1050_p1 }
   0xf   :  { %v898_v21 = vld [vmem:[%s1367_s11] ss:$0 sm:$0xff] }
  0x10   :  { %p1053_p4 = pnand %p1052_p3, %p1046_p0 }
  0x12   :  { %932 = vmatmul.mubr.msk.bf16.vlgmr.msra.gmra.mrb[0].mxu0 %vm84_vm3, %v83_v13 }
  0x13   :  { %943 = vmatprep.mubr.msk.bf16.mxu0 %vm1094_vm0, %v1093_v1  ;;  %942 = vmatpush3.bf16.msra.mxu0 %v183_v16 }
  0x14   :  { %953 = vmatprep.subr.bf16.mxu0 %v1093_v1  ;;  %938 = vmatmul.mubr.msk.bf16.vlgmr.msra.gmra.mrb[0].mxu1 %vm84_vm3, %v68_v8  ;;  %v1028_v8 = vld [vmem:[%s1366_s10] sm:$0xff]  }
  0x15   :  { %948 = vmatpush3.bf16.msra.mxu1 %v238_v22  ;;  %949 = vmatprep.mubr.msk.bf16.mxu1 %vm1094_vm0, %v1093_v1 }
  0x16   :  { %959 = vmatprep.subr.bf16.mxu1 %v1093_v1 }
  0x1c   :  { %950 = vmatmul.mubr.msk.bf16.vlgmr.msra.gmra.mrb[4].mxu1 %vm232_vm8, %v183_v16 }
  0x1d   :  { %963 = vmatprep.mubr.msk.bf16.mxu1 %vm1094_vm0, %v1093_v1  ;;  %960 = vmatpush3.bf16.msra.mxu1 %v1024_v44 }
  0x1e   :  { %961 = vmatprep.subr.bf16.mxu1 %v1093_v1 }
  0x21   :  { %962 = vmatpush3.bf16.msra.mxu1 %v1026_v46 }
  0x22   :  { %975 = vmatprep.subr.bf16.mxu1 %v1093_v1 }
  0xe5   :  { %v125_v23 = vpop.f32.mrb[0].mxu0 }
  0xe6   :  { %v933_v24 = vpop.f32.mrb[1].mxu0 }
  0xe7   :  { %v128_v25 = vpop.f32.mrb[2].mxu0  ;;  %v1238_v30 = vpop.f32.mrb[0].mxu1 }
  0xe8   :  { %v1224_v26 = vpack.c.bf16 %v128_v25, %v125_v23  ;;  %v934_v27 = vpop.f32.mrb[3].mxu0  ;;  %178 = vst.msk [vmem:[#allocation2] sm:$0xff] %vm177_vm7, %v1238_v30  ;;  %v939_v31 = vpop.f32.mrb[1].mxu1 }
  0xe9   :  { %v1242_v32 = vpop.f32.mrb[2].mxu1 }
  0xea   :  { %944 = vmatmul.mubr.msk.bf16.vlgmr.msra.gmra.mrb[4].mxu0 %vm177_vm7, %v1224_v26  ;;  %179 = vst.msk [vmem:[#allocation2 + $0x8] sm:$0xff] %vm177_vm7, %v1242_v32  ;;  %v180_v33 = vpack.c.bf16 %v1242_v32, %v1238_v30  ;;  %v940_v34 = vpop.f32.mrb[3].mxu1  ;;  %v656_v44 = vsel %vm177_vm7, %v1242_v32, 0.0 }
  0xeb   :  { %955 = vmatprep.mubr.msk.bf16.mxu0 %vm1094_vm0, %v1093_v1  ;;  %954 = vmatpush3.bf16.msra.mxu0 %v285_v29 }
  0xec   :  { %967 = vmatprep.subr.bf16.mxu0 %v1093_v1 }
  0xef   :  { %v274_v40 = vpop.f32.mrb[4].mxu1 }
  0xf0   :  { %v951_v41 = vpop.f32.mrb[5].mxu1 }
  0xf1   :  { %v277_v42 = vpop.f32.mrb[6].mxu1 }
  0xf2   :  { %v952_v43 = vpop.f32.mrb[7].mxu1 }
  0xf3   :  { %v653_v43 = vsel %vm177_vm7, %v1238_v30, 0.0 }
 0x1bd   :  { %v224_v35 = vpop.f32.mrb[4].mxu0 }
 0x1be   :  { %v945_v36 = vpop.f32.mrb[5].mxu0 }
 0x1bf   :  { %v227_v37 = vpop.f32.mrb[6].mxu0 }
 0x1c0   :  { %v231_v38 = vpack.c.bf16 %v227_v37, %v224_v35  ;;  %v946_v39 = vpop.f32.mrb[7].mxu0 }
 0x1c2   :  { %956 = vmatmul.mubr.msk.bf16.vlgmr.msra.gmra.mrb[8].mxu0 %vm232_vm8, %v231_v38 }
 0x1c3   :  { %971 = vmatprep.mubr.msk.bf16.mxu0 %vm1094_vm0, %v1093_v1  ;;  %968 = vmatpush3.bf16.msra.mxu0 %v1025_v45  ;;  %v1095_v45 = vmov 0.0|0.0  }
 0x1c4   :  { %969 = vmatprep.subr.bf16.mxu0 %v1093_v1 }
 0x1c7   :  { %970 = vmatpush3.bf16.msra.mxu0 %v1027_v47 }
 0x1c8   :  { %981 = vmatprep.subr.bf16.mxu0 %v1093_v1 }
 0x295   :  { %v321_v49 = vpop.f32.mrb[8].mxu0 }
 0x296   :  { %v322_v50 = vadd.f32 %v321_v49, %v274_v40  ;;  %v957_v51 = vpop.f32.mrb[9].mxu0 }
 0x297   :  { %v324_v52 = vpop.f32.mrb[10].mxu0 }
 0x298   :  { %v334_v53 = vadd.f32 %v889_v48, %v322_v50  ;;  %v325_v54 = vadd.f32 %v324_v52, %v277_v42  ;;  %v958_v55 = vpop.f32.mrb[11].mxu0 }
 0x29a   :  { %v335_v56 = vadd.f32 %v889_v48, %v325_v54  ;;  %v336_v57 = vmax.f32 %v334_v53, 0.0 }
 0x29c   :  { %v337_v58 = vmax.f32 %v335_v56, 0.0 }
 0x29e   :  { %v338_v59 = vpack.c.bf16 %v337_v58, %v336_v57 }
 0x2a0   :  { %964 = vmatmul.mubr.msk.bf16.vlgmr.msra.gmra.mrb[8].mxu1 %vm84_vm3, %v338_v59  ;;  %972 = vmatmul.mubr.msk.bf16.vlgmr.msra.gmra.mrb[12].mxu0 %vm84_vm3, %v338_v59 }
 0x2a1   :  { %977 = vmatprep.mubr.msk.bf16.mxu1 %vm1094_vm0, %v1093_v1  ;;  %983 = vmatprep.mubr.msk.bf16.mxu0 %vm1094_vm0, %v1093_v1 }
 0x2a2   :  { %982 = vmatpush3.bf16.msra.mxu0 %v1028_v8 }
 0x2a3   :  { %1000 = vmatprep.subr.bf16.mxu0 %v1095_v45  ;;  %v807_v45 = vand.u32 127, %v47_v0 }
 0x2a5   :  { %vm808_vm13 = vcmp.eq.s32.totalorder %v1181_v3, %v807_v45 }
 0x373   :  { %v397_v60 = vpop.f32.mrb[8].mxu1  ;;  %v451_v61 = vpop.f32.mrb[12].mxu0 }
 0x374   :  { %v965_v62 = vpop.f32.mrb[9].mxu1  ;;  %v973_v63 = vpop.f32.mrb[13].mxu0 }
 0x375   :  { %v400_v2 = vpop.f32.mrb[10].mxu1  ;;  %v454_v4 = vpop.f32.mrb[14].mxu0 }
 0x376   :  { %v404_v5 = vpack.c.bf16 %v400_v2, %v397_v60  ;;  %v966_v6 = vpop.f32.mrb[11].mxu1  ;;  %v974_v7 = vpop.f32.mrb[15].mxu0 }
 0x378   :  { %976 = vmatpush3.bf16.msra.mxu1 %v404_v5 }
 0x379   :  { %987 = vmatprep.subr.bf16.mxu1 %v1093_v1 }
 0x37b   :  { %978 = vmatmul.mubr.msk.bf16.vlgmr.msra.gmra.mrb[12].mxu1 %vm177_vm7, %v1224_v26 }
 0x37c   :  { %989 = vmatprep.mubr.msk.bf16.mxu1 %vm1094_vm0, %v1093_v1 }
 0x44e   :  { %v492_v10 = vpop.f32.mrb[12].mxu1 }
 0x44f   :  { %v493_v11 = vadd.f32 %v492_v10, %v451_v61  ;;  %v979_v12 = vpop.f32.mrb[13].mxu1 }
 0x450   :  { %v495_v13 = vpop.f32.mrb[14].mxu1 }
 0x451   :  { %v505_v14 = vadd.f32 %v897_v9, %v493_v11  ;;  %v496_v15 = vadd.f32 %v495_v13, %v454_v4  ;;  %v980_v16 = vpop.f32.mrb[15].mxu1 }
 0x453   :  { %v506_v17 = vadd.f32 %v897_v9, %v496_v15  ;;  %v507_v18 = vmax.f32 %v505_v14, 0.0 }
 0x455   :  { %v508_v19 = vmax.f32 %v506_v17, 0.0 }
 0x457   :  { %v509_v20 = vpack.c.bf16 %v508_v19, %v507_v18 }
 0x459   :  { %984 = vmatmul.mubr.msk.bf16.vlgmr.msra.gmra.mrb[16].mxu0 %vm177_vm7, %v509_v20 }
 0x45a   :  { %997 = vmatprep.mubr.msk.f32.mxu0 %vm1094_vm0, %v1093_v1 }
 0x52c   :  { %v562_v22 = vpop.f32.mrb[16].mxu0 }
 0x52d   :  { %v563_v23 = vadd.f32 %v898_v21, %v562_v22  ;;  %v985_v24 = vpop.f32.mrb[17].mxu0 }
 0x52e   :  { %v565_v25 = vpop.f32.mrb[18].mxu0 }
 0x52f   :  { %v566_v26 = vadd.f32 %v898_v21, %v565_v25  ;;  %v986_v27 = vpop.f32.mrb[19].mxu0  ;;  %v570_v28 = vsel %vm569_vm9, %v563_v23, -inf }
 0x530   :  { %571 = vmax.xlane.f32.xlu0 %v570_v28 }
 0x531   :  { %v573_v29 = vsel %vm569_vm9, %v566_v26, -inf }
 0x534   :  { %574 = vmax.xlane.f32.xlu0 %v573_v29 }
 0x5bd   :  { %v572_v31 = vpop.xlane.xlu0 %571 }
 0x5be   :  { %v576_v34 = vsub.f32 %v563_v23, %v572_v31 }
 0x5c0   :  { %v578_v35 = vmul.f32 1.442695, %v576_v34 }
 0x5c1   :  { %v575_v36 = vpop.xlane.xlu0 %574 }
 0x5c2   :  { %1029 = vpow2.f32 %v578_v35  ;;  %v577_v37 = vsub.f32 %v566_v26, %v575_v36 }
 0x5c4   :  { %v580_v38 = vmul.f32 1.442695, %v577_v37 }
 0x5c6   :  { %1031 = vpow2.f32 %v580_v38 }
 0x5cc   :  { %v1030_v39 = vpop.eup %1029 }
 0x5cd   :  { %v582_v40 = vsel %vm569_vm9, %v1030_v39, 0.0 }
 0x5ce   :  { %583 = vadd.xlane.f32.xlu1 %v582_v40 }
 0x5d0   :  { %v1032_v41 = vpop.eup %1031 }
 0x5d1   :  { %v585_v42 = vsel %vm569_vm9, %v1032_v41, 0.0 }
 0x5d2   :  { %586 = vadd.xlane.f32.xlu1 %v585_v42 }
 0x5d6   :  { %654 = vadd.xlane.f32.xlu1 %v653_v43 }
 0x5da   :  { %657 = vadd.xlane.f32.xlu1 %v656_v44 }
 0x65b   :  { %v584_v46 = vpop.xlane.xlu1 %583 }
 0x65c   :  { %1033 = vrcp.f32 %v584_v46  ;;  %v903_v46 = vsel %vm808_vm13, 1.0, %v1093_v1 }
 0x65f   :  { %v587_v47 = vpop.xlane.xlu1 %586 }
 0x660   :  { %1035 = vrcp.f32 %v587_v47  ;;  %v815_v47 = vmul.f32 0.5, %v903_v46 }
 0x663   :  { %v655_v54 = vpop.xlane.xlu1 %654 }
 0x666   :  { %v1034_v48 = vpop.eup %1033 }
 0x667   :  { %v590_v49 = vmul.f32 %v1034_v48, %v1030_v39  ;;  %v658_v55 = vpop.xlane.xlu1 %657 }
 0x669   :  { %592 = vst.msk [vmem:[%s1368_s12] sm:$0xff] %vm569_vm9, %v590_v49  ;;  %680 = vxpose.xlu0.b32.start [1/2] (short) (narrow) %v590_v49, 8  ;;  %v659_v58 = vmul.f32 %v655_v54, %v590_v49 }
 0x66a   :  { %v1036_v50 = vpop.eup %1035 }
 0x66b   :  { %v591_v51 = vmul.f32 %v1036_v50, %v1032_v41  ;;  %v661_v4 = vmul.f32 %v659_v58, %v590_v49 }
 0x66d   :  { %593 = vst.msk [vmem:[%s1368_s12 + $0x8] sm:$0xff] %vm569_vm9, %v591_v51  ;;  %681 = vxpose.xlu0.b32.end [2/2] (short) (narrow) %v591_v51, 8  ;;  %v594_v52 = vpack.c.bf16 %v591_v51, %v590_v49  ;;  %v660_v56 = vmul.f32 %v658_v55, %v591_v51  ;;  %v663_v6 = vsel %vm569_vm9, %v661_v4, 0.0 }
 0x66f   :  { %988 = vmatpush3.bf16.msra.mxu1 %v594_v52  ;;  %1002 = vmatpush3.bf16.msra.mxu0 %v594_v52  ;;  %v662_v62 = vmul.f32 %v660_v56, %v591_v51 }
 0x672   :  { %990 = vmatmul.mubr.msk.bf16.vlgmr.msra.gmra.mrb[16].mxu1 %vm177_vm7, %v180_v33  ;;  %v664_v33 = vsel %vm569_vm9, %v662_v62, 0.0 }
 0x673   :  { %v665_v7 = vadd.f32 %v664_v33, %v663_v6 }
 0x6e9   :  { %v696_v53 = vpop.trf.xlu0 }
 0x6ea   :  { %998 = vmatmul.mubr.msk.f32.vlgmr.msra.gmra.mrb[20].mxu0 %vm177_vm7, %v696_v53 }
 0x745   :  { %v632_v57 = vpop.f32.mrb[16].mxu1 }
 0x746   :  { %v639_v59 = vmul.f32 %v632_v57, %v590_v49  ;;  %v991_v60 = vpop.f32.mrb[17].mxu1 }
 0x747   :  { %v635_v61 = vpop.f32.mrb[18].mxu1 }
 0x748   :  { %v640_v63 = vmul.f32 %v635_v61, %v591_v51  ;;  %v992_v2 = vpop.f32.mrb[19].mxu1  ;;  %v641_v5 = vsel %vm569_vm9, %v639_v59, 0.0 }
 0x74a   :  { %v642_v30 = vsel %vm569_vm9, %v640_v63, 0.0 }
 0x74b   :  { %v643_v32 = vadd.f32 %v642_v30, %v641_v5 }
 0x74d   :  { %644 = vadd.xlane.f32.xlu1 %v643_v32 }
 0x751   :  { %666 = vadd.xlane.f32.xlu1 %v665_v7 }
 0x7bd   :  { %v781_v8 = vpop.f32.mrb[20].mxu0 }
 0x7be   :  { %v785_v9 = vmul.f32 %v781_v8, %v781_v8  ;;  %v999_v10 = vpop.f32.mrb[21].mxu0 }
 0x7c0   :  { %v787_v11 = vsel %vm786_vm10, %v785_v9, 0.0 }
 0x7c1   :  { %788 = vadd.xlane.f32.xlu1 %v787_v11 }
 0x7da   :  { %v645_v12 = vpop.xlane.xlu1 %644 }
 0x7db   :  { %v646_v13 = vrot.slane %v645_v12, 4 }
 0x7dd   :  { %v647_v14 = vadd.f32 %v646_v13, %v645_v12 }
 0x7de   :  { %v667_v15 = vpop.xlane.xlu1 %666 }
 0x7df   :  { %v648_v16 = vrot.slane %v647_v14, 2  ;;  %v668_v17 = vrot.slane %v667_v15, 4 }
 0x7e1   :  { %v669_v18 = vadd.f32 %v668_v17, %v667_v15  ;;  %v649_v19 = vadd.f32 %v648_v16, %v647_v14 }
 0x7e3   :  { %v670_v20 = vrot.slane %v669_v18, 2  ;;  %v650_v21 = vrot.slane %v649_v19, 1 }
 0x7e5   :  { %v651_v22 = vadd.f32 %v650_v21, %v649_v19  ;;  %v671_v23 = vadd.f32 %v670_v20, %v669_v18 }
 0x7e7   :  { %1003 = vpush %v651_v22  ;;  %v672_v24 = vrot.slane %v671_v23, 1 }
 0x7e9   :  { %v673_v25 = vadd.f32 %v672_v24, %v671_v23 }
 0x7eb   :  { %1005 = vpush %v673_v25 }
 0x818   :  { %s1319_s12 = spop %1003 }
 0x81c   :  { %s1006_s1 = spop %1005 }
 0x81d   :  { %v675_v26 = vstv %s1006_s1 }
 0x81e   :  { %1037 = vrcp.f32 %v675_v26 }
 0x828   :  { %v1038_v27 = vpop.eup %1037 }
 0x829   :  { %1007 = vpush %v1038_v27 }
 0x84e   :  { %v789_v28 = vpop.xlane.xlu1 %788 }
 0x84f   :  { %v790_v29 = vrot.slane %v789_v28, 4 }
 0x851   :  { %v791_v31 = vadd.f32 %v790_v29, %v789_v28 }
 0x853   :  { %v792_v34 = vrot.slane %v791_v31, 2 }
 0x855   :  { %v793_v35 = vadd.f32 %v792_v34, %v791_v31 }
 0x857   :  { %v794_v36 = vrot.slane %v793_v35, 1 }
 0x859   :  { %v795_v37 = vadd.f32 %v794_v36, %v793_v35 }
 0x85a   :  { %s1321_s18 = spop %1007 }
 0x85b   :  { %s678_s19 = smul.f32 %s1321_s18, %s1319_s12  ;;  %1009 = vpush %v795_v37 }
 0x88c   :  { %s1010_s2 = spop %1009 }
 0x88d   :  { %v797_v38 = vstv %s1010_s2 }
 0x88e   :  { %1039 = vrsqrt.f32 %v797_v38  ;;  %vm800_vm11 = vcmp.eq.f32.partialorder %v797_v38, inf  ;;  %v803_v41 = vand.u32 2147483648, %v797_v38  ;;  %vm802_vm12 = vcmp.eq.f32.partialorder %v797_v38, 0.0 }
 0x898   :  { %v1040_v39 = vpop.eup %1039 }
 0x899   :  { %v799_v40 = vmul.f32 %v1040_v39, %v797_v38 }
 0x89b   :  { %v801_v42 = vsel %vm800_vm11, %v797_v38, %v799_v40 }
 0x89c   :  { %v804_v43 = vsel %vm802_vm12, %v803_v41, %v801_v42 }
 0x89d   :  { %1011 = vpush %v804_v43 }
 0x8ce   :  { %s1012_s20 = spop %1011 }
 0x8cf   :  { %v811_v44 = vstv %s1012_s20 }
 0x8d0   :  { %1041 = vrcp.f32 %v811_v44 }
 0x8da   :  { %v1042_v48 = vpop.eup %1041 }
 0x8db   :  { %v813_v49 = vmul.f32 %v1042_v48, %v781_v8 }
 0x8dd   :  { %v816_v50 = vsub.f32 %v813_v49, %v815_v47 }
 0x8df   :  { %v817_v51 = vmul.f32 %v816_v50, %v816_v50 }
 0x8e1   :  { %v818_v52 = vsel %vm786_vm10, %v817_v51, 0.0 }
 0x8e2   :  { %819 = vadd.xlane.f32.xlu1 %v818_v52 }
 0x96f   :  { %v820_v53 = vpop.xlane.xlu1 %819 }
 0x970   :  { %v821_v54 = vrot.slane %v820_v53, 4 }
 0x972   :  { %v822_v55 = vadd.f32 %v821_v54, %v820_v53 }
 0x973   :  { %1056 = shalt.err (!%p1053_p4)
}
 0x974   :  { %s1057_s23 = scalar_lea.hbm %s1369_s13, 256 }
 0x975   :  { %p1058_p5 = scmp.ne.s32.totalorder %s1369_s13, %s1057_s23  ;;  %p1061_p6 = scmp.lt.u32.totalorder %s1057_s23, %s1369_s13 }
 0x977   :  { %p1063_p7 = pnand %p1061_p6, %p1058_p5 }
 0x979   :  { %1066 = shalt.err (!%p1063_p7)
}
 0x97a   :  { %s1097_s28 = smov 128   ;;  %s1098_s29 = smov 8   ;;  %v823_v0 = vrot.slane %v822_v55, 2  ;;  %vm837_vm0 = vcmp.eq.s32.totalorder %v807_v45, 0  ;;  %vm841_vm1 = vcmask 8192  }
 0x97b   :  { %856 = dma.vmem_to_hbm [thread:$0]  %s851_s3, 256, %s1369_s13, [#allocation3], %s1097_s28, %s1097_s28, %s1098_s29  }
 0x97c   :  { %v824_v1 = vadd.f32 %v823_v0, %v822_v55  ;;  %s679_s13 = ssub.f32 0.0, %s678_s19  ;;  %s1099_s9 = smov [#allocation4]  }
 0x97d   :  { %s863_s15 = sshll.u32 %s1099_s9, 4  ;;  %s864_s15 = int_to_ptr.vmem [resolvable:$true] %s863_s15 }
 0x97e   :  { %v825_v3 = vrot.slane %v824_v1, 1  ;;  %v838_v63 = vstv %s679_s13  ;;  %s1067_s16 = scalar_lea.vmem %s864_s15, 16  ;;  %s1071_s8 = scalar_lea.vmem %s864_s15, 32 }
 0x97f   :  { %p1068_p8 = scmp.ne.s32.totalorder %s864_s15, %s1067_s16  ;;  %p1072_p9 = scmp.lt.s32.totalorder %s864_s15, %s864_s15 }
 0x980   :  { %v826_v56 = vadd.f32 %v825_v3, %v824_v1  ;;  %p1073_p10 = scmp.lt.s32.totalorder %s1071_s8, %s1067_s16 }
 0x982   :  { %1013 = vpush %v826_v56  ;;  %p1074_p11 = por %p1073_p10, %p1072_p9 }
 0x984   :  { %p1075_p12 = pnand %p1074_p11, %p1068_p8 }
 0x9b3   :  { %s1014_s7 = spop %1013 }
 0x9b4   :  { %v828_v57 = vstv %s1014_s7 }
 0x9b5   :  { %1043 = vrsqrt.f32 %v828_v57  ;;  %vm831_vm14 = vcmp.eq.f32.partialorder %v828_v57, inf  ;;  %v834_v60 = vand.u32 2147483648, %v828_v57  ;;  %vm833_vm15 = vcmp.eq.f32.partialorder %v828_v57, 0.0 }
 0x9bf   :  { %v1044_v58 = vpop.eup %1043 }
 0x9c0   :  { %v830_v59 = vmul.f32 %v1044_v58, %v828_v57 }
 0x9c2   :  { %v832_v61 = vsel %vm831_vm14, %v828_v57, %v830_v59 }
 0x9c3   :  { %v835_v62 = vsel %vm833_vm15, %v834_v60, %v832_v61 }
 0x9c4   :  { %1015 = vpush %v835_v62 }
 0x9f5   :  { %s1016_s10 = spop %1015 }
 0x9f6   :  { %v839_v2 = vstv %s1016_s10 }
 0x9f7   :  { %v840_v4 = vsel %vm837_vm0, %v838_v63, %v839_v2 }
 0x9f8   :  { %842 = vst.msk [vmem:[#allocation4] sm:$0x1] %vm841_vm1, %v840_v4 }
 0x9f9   :  { %1078 = shalt.err (!%p1075_p12)
}
 0x9fa   :  { %s1079_s17 = scalar_lea.hbm %s1370_s14, 16 }
 0x9fb   :  { %p1080_p13 = scmp.ne.s32.totalorder %s1370_s14, %s1079_s17  ;;  %p1083_p0 = scmp.lt.u32.totalorder %s1079_s17, %s1370_s14 }
 0x9fd   :  { %p1085_p1 = pnand %p1083_p0, %p1080_p13 }
 0x9ff   :  { %1088 = shalt.err (!%p1085_p1)
}
 0xa00   :  { %866 = dma.vmem_to_hbm [thread:$0]  %s864_s15, 16, %s1370_s14, [#allocation5]  }
 0xa01   :  { %1089 = dma.done.wait [#allocation3], 256  }
 0xa02   :  { %1090 = vsyncadd [#allocation3], 4294967040 }
 0xa03   :  { %1091 = dma.done.wait [#allocation5], 16  }
 0xa04   :  { %1092 = vsyncadd [#allocation5], 4294967280 }
 0xa05   :  { %875 = vsyncpa [#allocation3], 1 }
 0xa06   :  { %876 = vsyncpa [#allocation5], 1 }

</bundles_post_ra>
